<compile_context>
chip_gen: v5e
topology: v5e:2x2
jax: 0.10.0
libtpu: 0.0.40
codegen_flags: <defaults>
</compile_context>

<pallas_src>
import functools

import jax
import jax.numpy as jnp
import numpy as np
from jax.experimental import pallas as pl
from jax.experimental.pallas import tpu as pltpu

_LANES = 128
_MAX_BLOCK_ROWS = 2048        # 2048 * 128 * 4B = 1 MiB per f32 buffer (x2 for in/out, x2 double-buffer)
_VMEM_LIMIT = 32 * 1024 * 1024  # safe on v5e/v6e/v7x


def _round_up(a, b):
    return (a + b - 1) // b * b


# ----------------------------- Pallas kernels ------------------------------ #

def _mulaw_quant_kernel(params_ref, x_ref, o_ref, *, n_bits):
    # params_ref (SMEM f32, shape (4,)), scalars hoisted in the wrapper:
    #   [0] mu / max_abs          (folds the x/max_abs normalization into the log1p arg)
    #   [1] 1 / log1p(mu)
    #   [2] log1p(mu)
    #   [3] max_abs / mu          (folds the final *max_abs and /mu)
    mu_over_max_abs = params_ref[0]
    inv_log1p_mu = params_ref[1]
    log1p_mu = params_ref[2]
    out_scale = params_ref[3]

    qmax = float(2 ** n_bits - 1)
    delta = 2.0 / qmax            # (1 - (-1)) / (2^n - 1)
    inv_delta = qmax / 2.0

    x = x_ref[...].astype(jnp.float32)

    # mu-law companding: sign(x_norm) * log1p(mu*|x_norm|) / log1p(mu)   (grad_sign -> sign in fwd)
    s = jnp.sign(x)
    x_mu = s * (jnp.log1p(jnp.abs(x) * mu_over_max_abs) * inv_log1p_mu)

    # asymmetric linear quantization of the companded signal over fixed [-1, 1], zp = -1
    X = jnp.round((x_mu + 1.0) * inv_delta)            # round_ste -> round in forward
    x_mu_q = jnp.clip(X, 0.0, qmax) * delta - 1.0

    # mu-law expansion: sign * ((1+mu)^|x| - 1) / mu * max_abs  (pow -> exp with hoisted log1p(mu))
    y = jnp.sign(x_mu_q) * ((jnp.exp(jnp.abs(x_mu_q) * log1p_mu) - 1.0) * out_scale)
    o_ref[...] = y.astype(o_ref.dtype)


def _observer_kernel(params_ref, x_ref, o_min_ref, o_max_ref, min_sc, max_sc,
                     *, n_valid, block_elems):
    # params_ref (SMEM f32, shape (3,)): [min_range, max_range, alpha]
    # o_min_ref / o_max_ref: (1,1) f32 outputs (written on the last grid step)
    # min_sc / max_sc: (1,1) f32 VMEM scratch holding the running min / max
    pid = pl.program_id(0)

    @pl.when(pid == 0)
    def _():
        min_sc[...] = jnp.full_like(min_sc, jnp.inf)
        max_sc[...] = jnp.full_like(max_sc, -jnp.inf)

    x = x_ref[...].astype(jnp.float32)

    if n_valid % block_elems != 0:
        # Only the final (partial) block contains out-of-range elements: mask them
        # with +/-inf using the global flat index (no wrapper-side padding tricks).
        base = pid * block_elems
        row_i = jax.lax.broadcasted_iota(jnp.int32, x.shape, 0)
        lane_i = jax.lax.broadcasted_iota(jnp.int32, x.shape, 1)
        flat = base + row_i * _LANES + lane_i
        valid = flat < n_valid
        x_for_min = jnp.where(valid, x, jnp.inf)
        x_for_max = jnp.where(valid, x, -jnp.inf)
    else:
        x_for_min = x
        x_for_max = x

    blk_min = jnp.min(jnp.min(x_for_min, axis=1, keepdims=True), axis=0, keepdims=True)
    blk_max = jnp.max(jnp.max(x_for_max, axis=1, keepdims=True), axis=0, keepdims=True)
    min_sc[...] = jnp.minimum(min_sc[...], blk_min)
    max_sc[...] = jnp.maximum(max_sc[...], blk_max)

    @pl.when(pid == pl.num_programs(0) - 1)
    def _():
        alpha = params_ref[2]
        o_min_ref[...] = alpha * params_ref[0] + (1.0 - alpha) * min_sc[...]
        o_max_ref[...] = alpha * params_ref[1] + (1.0 - alpha) * max_sc[...]


# ------------------------------ JAX wrappers -------------------------------- #

def _as_lane_slab(x):
    """Flatten x to a lane-dense (rows, 128) slab in its NATIVE dtype.

    Padding (a full extra HBM pass) is only done for ragged sizes (n % 128 != 0);
    partial boundary blocks along the row axis are handled by the grid instead.
    """
    n = x.size
    flat = x.reshape(-1)
    n_pad = _round_up(n, _LANES)
    if n_pad != n:
        flat = jnp.pad(flat, (0, n_pad - n))
    return flat.reshape(n_pad // _LANES, _LANES), n


def _choose_block_rows(rows):
    # multiple of 16 so bf16 sublane packing is always legal; capped at ~1 MiB f32
    return min(_MAX_BLOCK_ROWS, _round_up(max(rows, 1), 16))


@functools.partial(jax.jit, static_argnames=("n_bits",))
def mulaw_quantize_pallas(x, min_range, max_range, mu, n_bits):
    orig_shape = x.shape
    x2d, n = _as_lane_slab(x)
    rows = x2d.shape[0]
    block_rows = _choose_block_rows(rows)
    grid = pl.cdiv(rows, block_rows)

    # Hoist all scalar math (divides, log1p) out of the per-element kernel body.
    min_r = jnp.asarray(min_range, jnp.float32).reshape(())
    max_r = jnp.asarray(max_range, jnp.float32).reshape(())
    mu_s = jnp.asarray(mu, jnp.float32).reshape(())
    max_abs = jnp.maximum(jnp.abs(min_r), jnp.abs(max_r))
    log1p_mu = jnp.log1p(mu_s)
    params = jnp.stack([mu_s / max_abs, 1.0 / log1p_mu, log1p_mu, max_abs / mu_s])

    itemsize = jnp.dtype(x.dtype).itemsize
    cost = pl.CostEstimate(flops=16 * n, transcendentals=2 * n,
                           bytes_accessed=2 * n * itemsize)

    out2d = pl.pallas_call(
        functools.partial(_mulaw_quant_kernel, n_bits=n_bits),
        out_shape=jax.ShapeDtypeStruct((rows, _LANES), x.dtype),
        grid=(grid,),
        in_specs=[
            pl.BlockSpec(memory_space=pltpu.MemorySpace.SMEM),
            pl.BlockSpec((block_rows, _LANES), lambda i: (i, 0)),
        ],
        out_specs=pl.BlockSpec((block_rows, _LANES), lambda i: (i, 0)),
        compiler_params=pltpu.CompilerParams(
            dimension_semantics=("parallel",),
            vmem_limit_bytes=_VMEM_LIMIT),
        cost_estimate=cost,
    )(params, x2d)

    if rows * _LANES != n:                      # ragged input -> drop the padded tail
        return out2d.reshape(-1)[:n].reshape(orig_shape)
    return out2d.reshape(orig_shape)


@jax.jit
def observe_ranges_pallas(x, min_range, max_range, alpha):
    x2d, n = _as_lane_slab(x)
    rows = x2d.shape[0]
    block_rows = _choose_block_rows(rows)
    grid = pl.cdiv(rows, block_rows)

    params = jnp.stack([
        jnp.asarray(min_range, jnp.float32).reshape(()),
        jnp.asarray(max_range, jnp.float32).reshape(()),
        jnp.asarray(alpha, jnp.float32).reshape(()),
    ])

    itemsize = jnp.dtype(x.dtype).itemsize
    cost = pl.CostEstimate(flops=2 * n, transcendentals=0, bytes_accessed=n * itemsize)

    new_min, new_max = pl.pallas_call(
        functools.partial(_observer_kernel, n_valid=n,
                          block_elems=block_rows * _LANES),
        out_shape=(jax.ShapeDtypeStruct((1, 1), jnp.float32),
                   jax.ShapeDtypeStruct((1, 1), jnp.float32)),
        grid=(grid,),
        in_specs=[
            pl.BlockSpec(memory_space=pltpu.MemorySpace.SMEM),
            pl.BlockSpec((block_rows, _LANES), lambda i: (i, 0)),
        ],
        out_specs=(pl.BlockSpec((1, 1), lambda i: (0, 0)),
                   pl.BlockSpec((1, 1), lambda i: (0, 0))),
        scratch_shapes=[pltpu.VMEM((1, 1), jnp.float32),
                        pltpu.VMEM((1, 1), jnp.float32)],
        compiler_params=pltpu.CompilerParams(
            dimension_semantics=("arbitrary",),
            vmem_limit_bytes=_VMEM_LIMIT),
        cost_estimate=cost,
    )(params, x2d)
    return new_min.reshape(1), new_max.reshape(1)


# --------------------------- Module-like wrapper ----------------------------- #

class GradientNlActivationFakeQuantize:
    """Per-tensor non-linear (mu-law) fake quantization, forward pass only."""

    def __init__(self, gradient_based, n_bits=8, scale_grad=False, check_ranges=False):
        self.n_bits = n_bits
        # Deterministic parameter init exactly as the PyTorch module.
        self.min_range = jnp.array([-0.5], jnp.float32)
        self.max_range = jnp.array([0.5], jnp.float32)
        self.mu = jnp.array([1.0], jnp.float32)
        self.max_observations = 50
        self.observer_mode = True
        self.alpha = 0.9
        self.n_iter = 0
        self.sign = True
        self.scale_grad = scale_grad      # only affects gradients; identity in forward
        self.check_ranges = check_ranges  # debug only: forces a device->host sync

    def enable_observer(self, observer_mode):
        self.observer_mode = observer_mode

    def __call__(self, x):
        if self.observer_mode and self.n_iter < self.max_observations:
            self.n_iter += 1
            self.min_range, self.max_range = observe_ranges_pallas(
                x, self.min_range, self.max_range, self.alpha)
            return x
        if self.check_ranges:
            # Kept behind a flag: float() would force a host sync on every call.
            assert float(self.max_range[0]) >= float(self.min_range[0]), (
                f"Min range is {float(self.min_range[0])} which is bigger than "
                f"max range {float(self.max_range[0])}!")
        return mulaw_quantize_pallas(
            x, self.min_range, self.max_range, self.mu, self.n_bits)


# ------------------------------ Pure-JAX ref --------------------------------- #

def _mulaw_quantize_ref(x, min_range, max_range, mu, n_bits):
    max_abs = jnp.maximum(jnp.abs(min_range), jnp.abs(max_range))
    x_norm = x / max_abs
    x_mu = jnp.sign(x_norm) * jnp.log1p(mu * jnp.abs(x_norm)) / jnp.log1p(mu)
    qmax = float(2 ** n_bits - 1)
    delta = 2.0 / qmax
    zp = -1.0
    X = jnp.round((x_mu - zp) / delta)
    x_mu_q = delta * jnp.clip(X, 0.0, qmax) + zp
    y_norm = jnp.sign(x_mu_q) * (jnp.power(1.0 + mu, jnp.abs(x_mu_q)) - 1.0) / mu
    return y_norm * max_abs


# ---------------------------------- main ------------------------------------ #

if __name__ == "__main__":
    key = jax.random.PRNGKey(0)
    x = jax.random.normal(key, (2, 4, 16, 16), dtype=jnp.float32)  # NCHW activations

    fq = GradientNlActivationFakeQuantize(gradient_based=False, n_bits=8)

    # Observer phase: EMA range tracking, passthrough output.
    ema_min = jnp.float32(-0.5)
    ema_max = jnp.float32(0.5)
    for _ in range(3):
        y = fq(x)
        ema_min = 0.9 * ema_min + 0.1 * jnp.min(x)
        ema_max = 0.9 * ema_max + 0.1 * jnp.max(x)
    jax.block_until_ready(y)
    assert y.shape == x.shape
    np.testing.assert_allclose(np.asarray(fq.min_range)[0], np.asarray(ema_min),
                               rtol=1e-4, atol=1e-5)
    np.testing.assert_allclose(np.asarray(fq.max_range)[0], np.asarray(ema_max),
                               rtol=1e-4, atol=1e-5)

    # Quantization phase.
    fq.enable_observer(False)
    y_q = fq(x)
    jax.block_until_ready(y_q)
    y_ref = _mulaw_quantize_ref(x, fq.min_range, fq.max_range, fq.mu, fq.n_bits)
    np.testing.assert_allclose(np.asarray(y_q), np.asarray(y_ref), atol=5e-2)

    # Extra coverage: partial boundary block (n % 128 == 0, block_rows > rows remainder).
    x2 = jax.random.normal(jax.random.PRNGKey(1), (2, 4, 40, 40), jnp.float32) * 0.3
    y2 = mulaw_quantize_pallas(x2, fq.min_range, fq.max_range, fq.mu, fq.n_bits)
    np.testing.assert_allclose(
        np.asarray(y2),
        np.asarray(_mulaw_quantize_ref(x2, fq.min_range, fq.max_range, fq.mu, fq.n_bits)),
        atol=5e-2)
    nmin, nmax = observe_ranges_pallas(x2, fq.min_range, fq.max_range, 0.9)
    np.testing.assert_allclose(np.asarray(nmin)[0],
                               np.asarray(0.9 * fq.min_range[0] + 0.1 * jnp.min(x2)),
                               rtol=1e-4, atol=1e-5)
    np.testing.assert_allclose(np.asarray(nmax)[0],
                               np.asarray(0.9 * fq.max_range[0] + 0.1 * jnp.max(x2)),
                               rtol=1e-4, atol=1e-5)

    # Extra coverage: ragged size (n % 128 != 0) -> pad + slice path.
    x3 = jax.random.normal(jax.random.PRNGKey(2), (3, 5, 7, 11), jnp.float32) * 0.2
    y3 = mulaw_quantize_pallas(x3, fq.min_range, fq.max_range, fq.mu, fq.n_bits)
    np.testing.assert_allclose(
        np.asarray(y3),
        np.asarray(_mulaw_quantize_ref(x3, fq.min_range, fq.max_range, fq.mu, fq.n_bits)),
        atol=5e-2)

    jax.block_until_ready(y3)
    print("KERNEL_OK")
</pallas_src>

<mosaic_0001>
module attributes {stable_mosaic.version = 11 : i64} {
  func.func @_observer_kernel(%arg0: i32, %arg1: memref<3xf32, #tpu.memory_space<smem>>, %arg2: memref<16x128xf32, #tpu.memory_space<vmem>>, %arg3: memref<1x1xf32, #tpu.memory_space<vmem>>, %arg4: memref<1x1xf32, #tpu.memory_space<vmem>>, %arg5: memref<1x1xf32, #tpu.memory_space<vmem>>, %arg6: memref<1x1xf32, #tpu.memory_space<vmem>>) attributes {dimension_semantics = [#tpu.dimension_semantics<arbitrary>], iteration_bounds = array<i64: 1>, scalar_prefetch = 0 : i64, scratch_operands = 2 : i64, tpu.core_type = #tpu.core_type<tc>, window_params = [{transform_indices = @transform_0, window_bounds = array<i64: 3>}, {transform_indices = @transform_1, window_bounds = array<i64: 16, 128>}, {pipeline_mode = #tpu.pipeline_mode<synchronous>, transform_indices = @transform_2, window_bounds = array<i64: 1, 1>}, {pipeline_mode = #tpu.pipeline_mode<synchronous>, transform_indices = @transform_3, window_bounds = array<i64: 1, 1>}]} {
    %c0_i32 = arith.constant 0 : i32
    %0 = arith.cmpi eq, %arg0, %c0_i32 : i32
    %1 = arith.extui %0 : i1 to i32
    %c0_i32_0 = arith.constant 0 : i32
    %2 = arith.cmpi ne, %1, %c0_i32_0 : i32
    scf.if %2 {
      %cst_15 = arith.constant 0x7F800000 : f32
      %21 = vector.broadcast %cst_15 : f32 to vector<1x1xf32>
      %c0_16 = arith.constant 0 : index
      %c0_17 = arith.constant 0 : index
      %22 = vector.load %arg5[%c0_16, %c0_17] : memref<1x1xf32, #tpu.memory_space<vmem>>, vector<1x1xf32>
      tpu.vector_store %arg5[%c0_16, %c0_17], %21 {strides = array<i32>} : memref<1x1xf32, #tpu.memory_space<vmem>>, vector<1x1xf32>,
      %cst_18 = arith.constant 0xFF800000 : f32
      %23 = vector.broadcast %cst_18 : f32 to vector<1x1xf32>
      %c0_19 = arith.constant 0 : index
      %c0_20 = arith.constant 0 : index
      %24 = vector.load %arg6[%c0_19, %c0_20] : memref<1x1xf32, #tpu.memory_space<vmem>>, vector<1x1xf32>
      tpu.vector_store %arg6[%c0_19, %c0_20], %23 {strides = array<i32>} : memref<1x1xf32, #tpu.memory_space<vmem>>, vector<1x1xf32>,
    } else {
    }
    %c0 = arith.constant 0 : index
    %c0_1 = arith.constant 0 : index
    %3 = vector.load %arg2[%c0, %c0_1] : memref<16x128xf32, #tpu.memory_space<vmem>>, vector<16x128xf32>
    %cst = arith.constant dense<0x7F800000> : vector<16xf32>
    %4 = vector.multi_reduction <minimumf>, %3, %cst [1] : vector<16x128xf32> to vector<16xf32>
    %5 = vector.shape_cast %4 : vector<16xf32> to vector<16x1xf32>
    %cst_2 = arith.constant dense<0x7F800000> : vector<1xf32>
    %6 = vector.multi_reduction <minimumf>, %5, %cst_2 [0] : vector<16x1xf32> to vector<1xf32>
    %7 = vector.shape_cast %6 : vector<1xf32> to vector<1x1xf32>
    %cst_3 = arith.constant dense<0xFF800000> : vector<16xf32>
    %8 = vector.multi_reduction <maximumf>, %3, %cst_3 [1] : vector<16x128xf32> to vector<16xf32>
    %9 = vector.shape_cast %8 : vector<16xf32> to vector<16x1xf32>
    %cst_4 = arith.constant dense<0xFF800000> : vector<1xf32>
    %10 = vector.multi_reduction <maximumf>, %9, %cst_4 [0] : vector<16x1xf32> to vector<1xf32>
    %11 = vector.shape_cast %10 : vector<1xf32> to vector<1x1xf32>
    %c0_5 = arith.constant 0 : index
    %c0_6 = arith.constant 0 : index
    %12 = vector.load %arg5[%c0_5, %c0_6] : memref<1x1xf32, #tpu.memory_space<vmem>>, vector<1x1xf32>
    %13 = arith.minimumf %12, %7 : vector<1x1xf32>
    %c0_7 = arith.constant 0 : index
    %c0_8 = arith.constant 0 : index
    %14 = vector.load %arg5[%c0_7, %c0_8] : memref<1x1xf32, #tpu.memory_space<vmem>>, vector<1x1xf32>
    tpu.vector_store %arg5[%c0_7, %c0_8], %13 {strides = array<i32>} : memref<1x1xf32, #tpu.memory_space<vmem>>, vector<1x1xf32>,
    %c0_9 = arith.constant 0 : index
    %c0_10 = arith.constant 0 : index
    %15 = vector.load %arg6[%c0_9, %c0_10] : memref<1x1xf32, #tpu.memory_space<vmem>>, vector<1x1xf32>
    %16 = arith.maximumf %15, %11 : vector<1x1xf32>
    %c0_11 = arith.constant 0 : index
    %c0_12 = arith.constant 0 : index
    %17 = vector.load %arg6[%c0_11, %c0_12] : memref<1x1xf32, #tpu.memory_space<vmem>>, vector<1x1xf32>
    tpu.vector_store %arg6[%c0_11, %c0_12], %16 {strides = array<i32>} : memref<1x1xf32, #tpu.memory_space<vmem>>, vector<1x1xf32>,
    %c0_i32_13 = arith.constant 0 : i32
    %18 = arith.cmpi eq, %arg0, %c0_i32_13 : i32
    %19 = arith.extui %18 : i1 to i32
    %c0_i32_14 = arith.constant 0 : i32
    %20 = arith.cmpi ne, %19, %c0_i32_14 : i32
    scf.if %20 {
      %c2 = arith.constant 2 : index
      %21 = memref.load %arg1[%c2] : memref<3xf32, #tpu.memory_space<smem>>
      %c0_15 = arith.constant 0 : index
      %22 = memref.load %arg1[%c0_15] : memref<3xf32, #tpu.memory_space<smem>>
      %23 = arith.mulf %21, %22 : f32
      %cst_16 = arith.constant 1.000000e+00 : f32
      %24 = arith.subf %cst_16, %21 : f32
      %c0_17 = arith.constant 0 : index
      %c0_18 = arith.constant 0 : index
      %25 = vector.load %arg5[%c0_17, %c0_18] : memref<1x1xf32, #tpu.memory_space<vmem>>, vector<1x1xf32>
      %26 = vector.broadcast %24 : f32 to vector<1x1xf32>
      %27 = arith.mulf %26, %25 : vector<1x1xf32>
      %28 = vector.broadcast %23 : f32 to vector<1x1xf32>
      %29 = arith.addf %28, %27 : vector<1x1xf32>
      %c0_19 = arith.constant 0 : index
      %c0_20 = arith.constant 0 : index
      %30 = vector.load %arg3[%c0_19, %c0_20] : memref<1x1xf32, #tpu.memory_space<vmem>>, vector<1x1xf32>
      tpu.vector_store %arg3[%c0_19, %c0_20], %29 {strides = array<i32>} : memref<1x1xf32, #tpu.memory_space<vmem>>, vector<1x1xf32>,
      %c1 = arith.constant 1 : index
      %31 = memref.load %arg1[%c1] : memref<3xf32, #tpu.memory_space<smem>>
      %32 = arith.mulf %21, %31 : f32
      %cst_21 = arith.constant 1.000000e+00 : f32
      %33 = arith.subf %cst_21, %21 : f32
      %c0_22 = arith.constant 0 : index
      %c0_23 = arith.constant 0 : index
      %34 = vector.load %arg6[%c0_22, %c0_23] : memref<1x1xf32, #tpu.memory_space<vmem>>, vector<1x1xf32>
      %35 = vector.broadcast %33 : f32 to vector<1x1xf32>
      %36 = arith.mulf %35, %34 : vector<1x1xf32>
      %37 = vector.broadcast %32 : f32 to vector<1x1xf32>
      %38 = arith.addf %37, %36 : vector<1x1xf32>
      %c0_24 = arith.constant 0 : index
      %c0_25 = arith.constant 0 : index
      %39 = vector.load %arg4[%c0_24, %c0_25] : memref<1x1xf32, #tpu.memory_space<vmem>>, vector<1x1xf32>
      tpu.vector_store %arg4[%c0_24, %c0_25], %38 {strides = array<i32>} : memref<1x1xf32, #tpu.memory_space<vmem>>, vector<1x1xf32>,
    } else {
    }
    return
  }
  func.func @transform_0(%arg0: i32) -> i32 {
    %c0_i32 = arith.constant 0 : i32
    %c0_i32_0 = arith.constant 0 : i32
    return %c0_i32 : i32
  }
  func.func @transform_1(%arg0: i32) -> (i32, i32) {
    %c0_i32 = arith.constant 0 : i32
    %c0_i32_0 = arith.constant 0 : i32
    return %arg0, %c0_i32 : i32, i32
  }
  func.func @transform_2(%arg0: i32) -> (i32, i32) {
    %c0_i32 = arith.constant 0 : i32
    %c0_i32_0 = arith.constant 0 : i32
    %c0_i32_1 = arith.constant 0 : i32
    return %c0_i32, %c0_i32_0 : i32, i32
  }
  func.func @transform_3(%arg0: i32) -> (i32, i32) {
    %c0_i32 = arith.constant 0 : i32
    %c0_i32_0 = arith.constant 0 : i32
    %c0_i32_1 = arith.constant 0 : i32
    return %c0_i32, %c0_i32_0 : i32, i32
  }
}

</mosaic_0001>

<bundles_post_ra>
// kernel: observe_ranges_pallas.1
= control target key start
LH: loop header
LB: loop body
LE: loop exit
PB: predicated region body
PF: predicated region fallthrough
CT: control target
= control target key end

     0   :  { %9 = vsyncpa [#allocation6], 0  ;;  %s238_s0 = inlined_call_operand.vmem [shape: f32[3], index: 0, kind: input, shape index: {}]   ;;  %s239_s1 = inlined_call_operand.vmem [shape: f32[16,128], index: 1, kind: input, shape index: {}]   ;;  %s240_s2 = inlined_call_operand.hbm [shape: f32[1,1], index: 2, kind: output, shape index: {0}]   ;;  %s241_s3 = inlined_call_operand.hbm [shape: f32[1,1], index: 3, kind: output, shape index: {1}]  }
   0x1   :  { %10 = vsyncpa [#allocation5], 0 }
   0x2   :  { %11 = vsyncpa [#allocation9], 0  ;;  %s17_s14 = sshll.u32 %s238_s0, 4  ;;  %s192_s15 = smov [#allocation4]   ;;  %s18_s14 = int_to_ptr.vmem [resolvable:$true] %s17_s14 }
   0x3   :  { %20 = dma.vmem_to_smem %s18_s14, 16, %s192_s15, [#allocation6]  }
   0x4   :  { %186 = dma.done.wait [#allocation6], 16  }
   0x5   :  { %187 = vsyncadd [#allocation6], 4294967280 }
   0x6   :  { %27 = sfence }
   0x7   :  { %v35_v0 = vld [vmem:[%s239_s1] sm:$0xff]  ;;  %v36_v1 = vld [vmem:[%s239_s1 + $0x8] sm:$0xff]  ;;  %vm32_vm0 = vcmask 0   ;;  %v193_v2 = vmov -inf   ;;  %v194_v3 = vmov inf   ;;  %s119_s0 = sld [smem:[#allocation4 + $0x2]] }
   0x8   :  { %48 = vmax.xlane.f32.xlu1 %v35_v0  ;;  %37 = vmin.xlane.f32.xlu0 %v35_v0  ;;  %34 = vst.msk [vmem:[#allocation3] sm:$0x1] %vm32_vm0, %v193_v2  ;;  %s120_s1 = sld [smem:[#allocation4 + $0x1]]  ;;  %s195_s24 = smov [#allocation8]  }
   0x9   :  { %33 = vst.msk [vmem:[#allocation2] sm:$0x1] %vm32_vm0, %v194_v3  ;;  %s70_s20 = sld [smem:[#allocation4]]  ;;  %s102_s25 = sshll.u32 %s195_s24, 4  ;;  %s103_s25 = int_to_ptr.vmem [resolvable:$true] %s102_s25 }
   0xa   :  { %s104_s28 = sshll.u32 %s241_s3, 4  ;;  %s196_s29 = smov [#allocation7]   ;;  %s105_s28 = int_to_ptr.hbm [resolvable:$true] %s104_s28 }
   0xb   :  { %s91_s30 = sshll.u32 %s196_s29, 4  ;;  %s93_s6 = sshll.u32 %s240_s2, 4  ;;  %s92_s30 = int_to_ptr.vmem [resolvable:$true] %s91_s30  ;;  %s94_s6 = int_to_ptr.hbm [resolvable:$true] %s93_s6 }
   0xd   :  { %s72_s21 = ssub.f32 1.0, %s119_s0 }
   0xe   :  { %s80_s22 = smul.f32 %s120_s1, %s119_s0 }
   0xf   :  { %v63_v20 = vld [vmem:[#allocation3] sm:$0x1]  ;;  %s71_s23 = smul.f32 %s119_s0, %s70_s20  ;;  %v74_v26 = vstv %s72_s21 }
  0x10   :  { %50 = vmax.xlane.f32.xlu1 %v36_v1  ;;  %39 = vmin.xlane.f32.xlu0 %v36_v1  ;;  %v59_v21 = vld [vmem:[#allocation2] sm:$0x1]  ;;  %v83_v28 = vstv %s80_s22 }
  0x11   :  { %v76_v30 = vstv %s71_s23 }
  0x7b   :  { %v49_v4 = vpop.xlane.xlu1 %48  ;;  %v38_v5 = vpop.xlane.xlu0 %37 }
  0x83   :  { %v51_v6 = vpop.xlane.xlu1 %50  ;;  %v40_v7 = vpop.xlane.xlu0 %39 }
  0x84   :  { %v52_v8 = vmax.f32 %v49_v4, %v51_v6  ;;  %v41_v9 = vmin.f32 %v38_v5, %v40_v7 }
  0x86   :  { %v53_v10 = vrot.slane %v52_v8, 4  ;;  %v42_v11 = vrot.slane %v41_v9, 4 }
  0x88   :  { %v54_v12 = vmax.f32 %v52_v8, %v53_v10  ;;  %v43_v13 = vmin.f32 %v41_v9, %v42_v11 }
  0x8a   :  { %v55_v14 = vrot.slane %v54_v12, 2  ;;  %v44_v15 = vrot.slane %v43_v13, 2 }
  0x8c   :  { %v56_v16 = vmax.f32 %v54_v12, %v55_v14  ;;  %v45_v17 = vmin.f32 %v43_v13, %v44_v15 }
  0x8e   :  { %v57_v18 = vrot.slane %v56_v16, 1  ;;  %v46_v19 = vrot.slane %v45_v17, 1 }
  0x90   :  { %v58_v22 = vmax.f32 %v56_v16, %v57_v18  ;;  %v47_v23 = vmin.f32 %v45_v17, %v46_v19 }
  0x92   :  { %v64_v24 = vmax.f32 %v63_v20, %v58_v22  ;;  %v60_v25 = vmin.f32 %v59_v21, %v47_v23 }
  0x94   :  { %65 = vst.msk [vmem:[#allocation3] sm:$0x1] %vm32_vm0, %v64_v24 }
  0x95   :  { %62 = vst.msk [vmem:[#allocation2] sm:$0x1] %vm32_vm0, %v60_v25 }
  0x9b   :  { %v81_v27 = vld [vmem:[#allocation3] sm:$0x1] }
  0x9c   :  { %v73_v29 = vld [vmem:[#allocation2] sm:$0x1]  ;;  %v82_v31 = vmul.f32 %v81_v27, %v74_v26 }
  0x9d   :  { %v75_v32 = vmul.f32 %v74_v26, %v73_v29 }
  0x9e   :  { %v84_v33 = vadd.f32 %v83_v28, %v82_v31 }
  0x9f   :  { %v77_v34 = vadd.f32 %v76_v30, %v75_v32 }
  0xa0   :  { %85 = vst.msk [vmem:[#allocation8] sm:$0x1] %vm32_vm0, %v84_v33 }
  0xa1   :  { %78 = vst.msk [vmem:[#allocation7] sm:$0x1] %vm32_vm0, %v77_v34  ;;  %107 = dma.vmem_to_hbm [thread:$0]  %s103_s25, 16, %s105_s28, [#allocation9]  }
  0xa2   :  { %96 = dma.vmem_to_hbm [thread:$0]  %s92_s30, 16, %s94_s6, [#allocation5]  }
  0xa3   :  { %188 = dma.done.wait [#allocation5], 16  }
  0xa4   :  { %189 = vsyncadd [#allocation5], 4294967280 }
  0xa5   :  { %190 = dma.done.wait [#allocation9], 16  }
  0xa6   :  { %191 = vsyncadd [#allocation9], 4294967280 }
  0xa7   :  { %116 = vsyncpa [#allocation5], 1 }
  0xa8   :  { %117 = vsyncpa [#allocation9], 1 }
  0xa9   :  { %118 = vsyncpa [#allocation6], 1 }

</bundles_post_ra>
